<compile_context>
chip_gen: v5e
topology: v5e:2x2
jax: 0.10.0
libtpu: 0.0.40
codegen_flags: <defaults>
</compile_context>

<pallas_src>
import jax
import jax.numpy as jnp
from jax.experimental import pallas as pl
from jax.experimental.pallas import tpu as pltpu


def _decoder_channel_sizes(nb_features, nb_channels, nb_layers):
    """Replicates Decoder.build(): (C_in, C_out) per conv layer."""
    sizes = []
    in_ch = nb_features
    out_ch = 64 * 2 ** (nb_layers - 2)
    for _ in range(nb_layers - 1):
        sizes.append((in_ch, out_ch))
        in_ch = out_ch
        out_ch = out_ch // 2
    sizes.append((in_ch, nb_channels))  # final conv, no ReLU
    return sizes


def _round_up(x, m):
    return ((x + m - 1) // m) * m


def _pick_tile_cols(n_batch, hw, max_tile=2048, min_grid_steps=4):
    """Fixed 128-multiple spatial tile for a ragged (cdiv) grid.

    Also shrinks the tile so N * cdiv(HW, tile) >= min_grid_steps when possible, keeping
    both v7x TensorCores fed and hiding pipeline ramp.  Never goes below 128 lanes.
    """
    tile = min(max_tile, _round_up(hw, 128))
    tile -= tile % 128
    tile = max(tile, 128)
    while tile > 128 and n_batch * pl.cdiv(hw, tile) < min_grid_steps:
        tile -= 128
    return tile


def _make_decoder_kernel(num_convs):
    def kernel(x_ref, *refs):
        # refs = (wt0, b0, wt1, b1, ..., wt_{L-1}, b_{L-1}, out_ref)
        out_ref = refs[-1]
        params = refs[:-1]
        # bf16 MXU operand straight from the input tile (no dead f32 copy).
        h = x_ref[...].astype(jnp.bfloat16)                   # (C_in, T)
        for l in range(num_convs):
            wt = params[2 * l][...]                            # (C_out_l, C_in_l), bf16
            b = params[2 * l + 1][...]                         # (C_out_l, 1), f32
            acc = jnp.dot(wt, h, preferred_element_type=jnp.float32)  # MXU, f32 acc
            acc = acc + b                                      # f32 epilogue (v5e-safe)
            if l < num_convs - 1:
                # ReLU in f32, then carry in bf16: halves live bytes feeding next matmul.
                h = jnp.maximum(acc, 0.0).astype(jnp.bfloat16)
            else:
                h = acc
        # NOTE: c_out_final may be < 8 sublanes -> masked stores; minor (output is the
        # smallest HBM term).  Pad output channels to 8 only if the consumer tolerates it.
        out_ref[...] = h.astype(out_ref.dtype)                 # (C_out_final, T) lane-dense
    return kernel


def prepare_decoder_params(weights_t, biases):
    """One-time parameter prep, OFF the per-call path.

    weights_t[l]: (C_out_l, C_in_l) -> bf16 (MXU-native, half the DMA/VMEM bytes).
    biases[l]:    (C_out_l,)        -> f32 (C_out_l, 1) for lane-broadcast bias-add.
    """
    w = tuple(jnp.asarray(wt, jnp.bfloat16) for wt in weights_t)
    b = tuple(jnp.asarray(bb, jnp.float32).reshape(-1, 1) for bb in biases)
    return w, b


def decoder_forward(x_nchw, weights_bf16, biases_f32, *, max_tile_cols=2048,
                    single_buffer_params=True):
    """x_nchw: (N, C_in, H, W), any float dtype (bf16 input halves the dominant HBM term).
    weights_bf16[l]: (C_out_l, C_in_l) bf16.  biases_f32[l]: (C_out_l, 1) f32."""
    N, C_in, H, W = x_nchw.shape
    HW = H * W
    num_convs = len(weights_bf16)
    c_out_final = int(weights_bf16[-1].shape[0])

    x = x_nchw.reshape(N, C_in, HW)                 # pure reshape, zero data movement
    tile = _pick_tile_cols(N, HW, max_tile_cols)
    grid = (N, pl.cdiv(HW, tile))                   # ragged: last block padded by Pallas

    kernel = _make_decoder_kernel(num_convs)

    # Constant parameter blocks (index_map is always (0, 0)): single-buffer them so they
    # are not double-buffered / re-fetched every grid step.
    param_kwargs = {}
    if single_buffer_params and hasattr(pl, "Buffered"):
        param_kwargs = dict(pipeline_mode=pl.Buffered(1))

    in_specs = [pl.BlockSpec((None, C_in, tile), lambda n, j: (n, 0, j))]
    kernel_args = [x]
    for wt, b in zip(weights_bf16, biases_f32):
        co, ci = wt.shape
        in_specs.append(pl.BlockSpec((co, ci), lambda n, j: (0, 0), **param_kwargs))
        in_specs.append(pl.BlockSpec((co, 1), lambda n, j: (0, 0), **param_kwargs))
        kernel_args.append(wt)
        kernel_args.append(b)

    # Per-step VMEM budget -> explicit scoped limit (clamped <= 48 MiB: v7x-safe).
    in_bytes = jnp.dtype(x_nchw.dtype).itemsize
    widest = max(int(w.shape[0]) for w in weights_bf16)
    param_bytes = sum(int(w.size) * 2 + int(b.size) * 4
                      for w, b in zip(weights_bf16, biases_f32))
    per_step = (2 * C_in * tile * in_bytes            # double-buffered input block
                + 2 * c_out_final * tile * in_bytes   # double-buffered output block
                + widest * tile * 4                   # widest f32 accumulator
                + widest * tile * 2                   # bf16 inter-layer carry
                + 2 * param_bytes)                    # params (worst case double-buffered)
    vmem_limit = int(min(max(4 * per_step, 32 << 20), 48 << 20))

    # Advisory roofline info (see header note: likely issue/MXU-bound on v7x, small K).
    flops = 2 * N * HW * sum(int(w.shape[0]) * int(w.shape[1]) for w in weights_bf16)
    bytes_accessed = int(x.size) * in_bytes + N * HW * c_out_final * in_bytes + param_bytes

    out = pl.pallas_call(
        kernel,
        out_shape=jax.ShapeDtypeStruct((N, c_out_final, HW), x_nchw.dtype),
        grid_spec=pltpu.PrefetchScalarGridSpec(
            num_scalar_prefetch=0,
            grid=grid,
            in_specs=in_specs,
            out_specs=pl.BlockSpec((None, c_out_final, tile), lambda n, j: (n, 0, j)),
        ),
        compiler_params=pltpu.CompilerParams(
            dimension_semantics=("parallel", "parallel"),
            vmem_limit_bytes=vmem_limit,
        ),
        cost_estimate=pl.CostEstimate(
            flops=flops, transcendentals=0, bytes_accessed=bytes_accessed),
    )(*kernel_args)

    # (N, C_out, H*W) -> NCHW: again a pure reshape.
    return out.reshape(N, c_out_final, H, W)


def decoder_reference(x_nchw, weights_bf16, biases_f32):
    """Pure-JAX reference with the identical bf16-operand / f32-accumulate / bf16-carry math."""
    N, C_in, H, W = x_nchw.shape
    num_convs = len(weights_bf16)
    h = x_nchw.reshape(N, C_in, H * W).astype(jnp.bfloat16)
    for l, (wt, b) in enumerate(zip(weights_bf16, biases_f32)):
        acc = jnp.einsum("oi,nis->nos", wt, h, preferred_element_type=jnp.float32)
        acc = acc + b.reshape(1, -1, 1)
        if l < num_convs - 1:
            h = jnp.maximum(acc, 0.0).astype(jnp.bfloat16)
        else:
            h = acc
    co = int(weights_bf16[-1].shape[0])
    return h.reshape(N, co, H, W).astype(x_nchw.dtype)


if __name__ == "__main__":
    # Module hyperparameters (consistent with Decoder.build()):
    nb_features = 16   # input channels
    nb_channels = 4    # output channels
    nb_layers = 3      # -> channel chain: 16 -> 128 -> 64 -> 4

    N, H, W = 2, 16, 16
    key = jax.random.PRNGKey(0)

    chan_sizes = _decoder_channel_sizes(nb_features, nb_channels, nb_layers)

    # Deterministic synthetic parameters; weights stored PyTorch-style (C_out, C_in).
    weights_t, biases = [], []
    for (ci, co) in chan_sizes:
        key, kw, kb = jax.random.split(key, 3)
        scale = 1.0 / jnp.sqrt(jnp.float32(ci))
        weights_t.append(jax.random.normal(kw, (co, ci), jnp.float32) * scale)
        biases.append(jax.random.normal(kb, (co,), jnp.float32) * scale)

    key, kx = jax.random.split(key)
    x = jax.random.normal(kx, (N, nb_features, H, W), jnp.float32)

    # One-time parameter prep (bf16 weights, (C,1) f32 biases) - off the per-call path.
    params = prepare_decoder_params(weights_t, biases)

    fwd = jax.jit(decoder_forward,
                  static_argnames=("max_tile_cols", "single_buffer_params"))
    try:
        y = jax.block_until_ready(fwd(x, *params))
    except Exception:
        # Fallback for jax versions that reject single-buffered constant blocks.
        y = jax.block_until_ready(fwd(x, *params, single_buffer_params=False))

    y_ref = jax.block_until_ready(decoder_reference(x, *params))

    assert y.shape == (N, nb_channels, H, W), y.shape
    assert jnp.allclose(y, y_ref, atol=2e-3, rtol=2e-3), "mismatch vs reference"

    print("KERNEL_OK")
</pallas_src>

<mosaic_0001>
module attributes {stable_mosaic.version = 11 : i64} {
  func.func @kernel(%arg0: i32, %arg1: i32, %arg2: memref<1x16x128xf32, #tpu.memory_space<vmem>>, %arg3: memref<128x16xbf16, #tpu.memory_space<vmem>>, %arg4: memref<128x1xf32, #tpu.memory_space<vmem>>, %arg5: memref<64x128xbf16, #tpu.memory_space<vmem>>, %arg6: memref<64x1xf32, #tpu.memory_space<vmem>>, %arg7: memref<4x64xbf16, #tpu.memory_space<vmem>>, %arg8: memref<4x1xf32, #tpu.memory_space<vmem>>, %arg9: memref<1x4x128xf32, #tpu.memory_space<vmem>>) attributes {dimension_semantics = [#tpu.dimension_semantics<parallel>, #tpu.dimension_semantics<parallel>], iteration_bounds = array<i64: 2, 2>, scalar_prefetch = 0 : i64, scratch_operands = 0 : i64, tpu.core_type = #tpu.core_type<tc>, window_params = [{transform_indices = @transform_0, window_bounds = array<i64: 1, 16, 128>}, {pipeline_mode = #tpu.pipeline_mode<synchronous>, transform_indices = @transform_1, window_bounds = array<i64: 128, 16>}, {pipeline_mode = #tpu.pipeline_mode<synchronous>, transform_indices = @transform_2, window_bounds = array<i64: 128, 1>}, {pipeline_mode = #tpu.pipeline_mode<synchronous>, transform_indices = @transform_3, window_bounds = array<i64: 64, 128>}, {pipeline_mode = #tpu.pipeline_mode<synchronous>, transform_indices = @transform_4, window_bounds = array<i64: 64, 1>}, {pipeline_mode = #tpu.pipeline_mode<synchronous>, transform_indices = @transform_5, window_bounds = array<i64: 4, 64>}, {pipeline_mode = #tpu.pipeline_mode<synchronous>, transform_indices = @transform_6, window_bounds = array<i64: 4, 1>}, {transform_indices = @transform_7, window_bounds = array<i64: 1, 4, 128>}]} {
    %c0 = arith.constant 0 : index
    %c0_0 = arith.constant 0 : index
    %c0_1 = arith.constant 0 : index
    %0 = vector.load %arg2[%c0, %c0_0, %c0_1] : memref<1x16x128xf32, #tpu.memory_space<vmem>>, vector<1x16x128xf32>
    %1 = vector.shape_cast %0 : vector<1x16x128xf32> to vector<16x128xf32>
    %2 = arith.truncf %1 : vector<16x128xf32> to vector<16x128xbf16>
    %c0_2 = arith.constant 0 : index
    %c0_3 = arith.constant 0 : index
    %3 = vector.load %arg3[%c0_2, %c0_3] : memref<128x16xbf16, #tpu.memory_space<vmem>>, vector<128x16xbf16>
    %c0_4 = arith.constant 0 : index
    %c0_5 = arith.constant 0 : index
    %4 = vector.load %arg4[%c0_4, %c0_5] : memref<128x1xf32, #tpu.memory_space<vmem>>, vector<128x1xf32>
    %cst = arith.constant dense<0.000000e+00> : vector<128x128xf32>
    %5 = tpu.matmul %3, %2, %cst {dimension_numbers = #tpu.dot_dimension_numbers<[1], [0], [0], [1], [0, 0, 1, 1], [], []>} : vector<128x16xbf16>, vector<16x128xbf16>, vector<128x128xf32> -> vector<128x128xf32>
    %6 = vector.broadcast %4 : vector<128x1xf32> to vector<128x128xf32>
    %7 = arith.addf %5, %6 : vector<128x128xf32>
    %cst_6 = arith.constant 0.000000e+00 : f32
    %8 = vector.broadcast %cst_6 : f32 to vector<128x128xf32>
    %9 = arith.maximumf %7, %8 : vector<128x128xf32>
    %10 = arith.truncf %9 : vector<128x128xf32> to vector<128x128xbf16>
    %c0_7 = arith.constant 0 : index
    %c0_8 = arith.constant 0 : index
    %11 = vector.load %arg5[%c0_7, %c0_8] : memref<64x128xbf16, #tpu.memory_space<vmem>>, vector<64x128xbf16>
    %c0_9 = arith.constant 0 : index
    %c0_10 = arith.constant 0 : index
    %12 = vector.load %arg6[%c0_9, %c0_10] : memref<64x1xf32, #tpu.memory_space<vmem>>, vector<64x1xf32>
    %cst_11 = arith.constant dense<0.000000e+00> : vector<64x128xf32>
    %13 = tpu.matmul %11, %10, %cst_11 {dimension_numbers = #tpu.dot_dimension_numbers<[1], [0], [0], [1], [0, 0, 1, 1], [], []>} : vector<64x128xbf16>, vector<128x128xbf16>, vector<64x128xf32> -> vector<64x128xf32>
    %14 = vector.broadcast %12 : vector<64x1xf32> to vector<64x128xf32>
    %15 = arith.addf %13, %14 : vector<64x128xf32>
    %cst_12 = arith.constant 0.000000e+00 : f32
    %16 = vector.broadcast %cst_12 : f32 to vector<64x128xf32>
    %17 = arith.maximumf %15, %16 : vector<64x128xf32>
    %18 = arith.truncf %17 : vector<64x128xf32> to vector<64x128xbf16>
    %c0_13 = arith.constant 0 : index
    %c0_14 = arith.constant 0 : index
    %19 = vector.load %arg7[%c0_13, %c0_14] : memref<4x64xbf16, #tpu.memory_space<vmem>>, vector<4x64xbf16>
    %c0_15 = arith.constant 0 : index
    %c0_16 = arith.constant 0 : index
    %20 = vector.load %arg8[%c0_15, %c0_16] : memref<4x1xf32, #tpu.memory_space<vmem>>, vector<4x1xf32>
    %cst_17 = arith.constant dense<0.000000e+00> : vector<4x128xf32>
    %21 = tpu.matmul %19, %18, %cst_17 {dimension_numbers = #tpu.dot_dimension_numbers<[1], [0], [0], [1], [0, 0, 1, 1], [], []>} : vector<4x64xbf16>, vector<64x128xbf16>, vector<4x128xf32> -> vector<4x128xf32>
    %22 = vector.broadcast %20 : vector<4x1xf32> to vector<4x128xf32>
    %23 = arith.addf %21, %22 : vector<4x128xf32>
    %c0_18 = arith.constant 0 : index
    %c0_19 = arith.constant 0 : index
    %c0_20 = arith.constant 0 : index
    %24 = vector.load %arg9[%c0_18, %c0_19, %c0_20] : memref<1x4x128xf32, #tpu.memory_space<vmem>>, vector<1x4x128xf32>
    %25 = vector.shape_cast %24 : vector<1x4x128xf32> to vector<4x128xf32>
    %26 = vector.shape_cast %23 : vector<4x128xf32> to vector<1x4x128xf32>
    tpu.vector_store %arg9[%c0_18, %c0_19, %c0_20], %26 {strides = array<i32>} : memref<1x4x128xf32, #tpu.memory_space<vmem>>, vector<1x4x128xf32>,
    return
  }
  func.func @transform_0(%arg0: i32, %arg1: i32) -> (i32, i32, i32) {
    %c0_i32 = arith.constant 0 : i32
    %c0_i32_0 = arith.constant 0 : i32
    return %arg0, %c0_i32, %arg1 : i32, i32, i32
  }
  func.func @transform_1(%arg0: i32, %arg1: i32) -> (i32, i32) {
    %c0_i32 = arith.constant 0 : i32
    %c0_i32_0 = arith.constant 0 : i32
    %c0_i32_1 = arith.constant 0 : i32
    return %c0_i32, %c0_i32_0 : i32, i32
  }
  func.func @transform_2(%arg0: i32, %arg1: i32) -> (i32, i32) {
    %c0_i32 = arith.constant 0 : i32
    %c0_i32_0 = arith.constant 0 : i32
    %c0_i32_1 = arith.constant 0 : i32
    return %c0_i32, %c0_i32_0 : i32, i32
  }
  func.func @transform_3(%arg0: i32, %arg1: i32) -> (i32, i32) {
    %c0_i32 = arith.constant 0 : i32
    %c0_i32_0 = arith.constant 0 : i32
    %c0_i32_1 = arith.constant 0 : i32
    return %c0_i32, %c0_i32_0 : i32, i32
  }
  func.func @transform_4(%arg0: i32, %arg1: i32) -> (i32, i32) {
    %c0_i32 = arith.constant 0 : i32
    %c0_i32_0 = arith.constant 0 : i32
    %c0_i32_1 = arith.constant 0 : i32
    return %c0_i32, %c0_i32_0 : i32, i32
  }
  func.func @transform_5(%arg0: i32, %arg1: i32) -> (i32, i32) {
    %c0_i32 = arith.constant 0 : i32
    %c0_i32_0 = arith.constant 0 : i32
    %c0_i32_1 = arith.constant 0 : i32
    return %c0_i32, %c0_i32_0 : i32, i32
  }
  func.func @transform_6(%arg0: i32, %arg1: i32) -> (i32, i32) {
    %c0_i32 = arith.constant 0 : i32
    %c0_i32_0 = arith.constant 0 : i32
    %c0_i32_1 = arith.constant 0 : i32
    return %c0_i32, %c0_i32_0 : i32, i32
  }
  func.func @transform_7(%arg0: i32, %arg1: i32) -> (i32, i32, i32) {
    %c0_i32 = arith.constant 0 : i32
    %c0_i32_0 = arith.constant 0 : i32
    return %arg0, %c0_i32, %arg1 : i32, i32, i32
  }
}

module attributes {stable_mosaic.version = 11 : i64} {
  func.func @kernel(%arg0: i32, %arg1: i32, %arg2: memref<1x16x128xf32, #tpu.memory_space<vmem>>, %arg3: memref<128x16xbf16, #tpu.memory_space<vmem>>, %arg4: memref<128x1xf32, #tpu.memory_space<vmem>>, %arg5: memref<64x128xbf16, #tpu.memory_space<vmem>>, %arg6: memref<64x1xf32, #tpu.memory_space<vmem>>, %arg7: memref<4x64xbf16, #tpu.memory_space<vmem>>, %arg8: memref<4x1xf32, #tpu.memory_space<vmem>>, %arg9: memref<1x4x128xf32, #tpu.memory_space<vmem>>) attributes {dimension_semantics = [#tpu.dimension_semantics<parallel>, #tpu.dimension_semantics<parallel>], iteration_bounds = array<i64: 2, 2>, scalar_prefetch = 0 : i64, scratch_operands = 0 : i64, tpu.core_type = #tpu.core_type<tc>, window_params = [{transform_indices = @transform_0, window_bounds = array<i64: 1, 16, 128>}, {pipeline_mode = #tpu.pipeline_mode<synchronous>, transform_indices = @transform_1, window_bounds = array<i64: 128, 16>}, {pipeline_mode = #tpu.pipeline_mode<synchronous>, transform_indices = @transform_2, window_bounds = array<i64: 128, 1>}, {pipeline_mode = #tpu.pipeline_mode<synchronous>, transform_indices = @transform_3, window_bounds = array<i64: 64, 128>}, {pipeline_mode = #tpu.pipeline_mode<synchronous>, transform_indices = @transform_4, window_bounds = array<i64: 64, 1>}, {pipeline_mode = #tpu.pipeline_mode<synchronous>, transform_indices = @transform_5, window_bounds = array<i64: 4, 64>}, {pipeline_mode = #tpu.pipeline_mode<synchronous>, transform_indices = @transform_6, window_bounds = array<i64: 4, 1>}, {transform_indices = @transform_7, window_bounds = array<i64: 1, 4, 128>}]} {
    %c0 = arith.constant 0 : index
    %c0_0 = arith.constant 0 : index
    %c0_1 = arith.constant 0 : index
    %0 = vector.load %arg2[%c0, %c0_0, %c0_1] : memref<1x16x128xf32, #tpu.memory_space<vmem>>, vector<1x16x128xf32>
    %1 = vector.shape_cast %0 : vector<1x16x128xf32> to vector<16x128xf32>
    %2 = arith.truncf %1 : vector<16x128xf32> to vector<16x128xbf16>
    %c0_2 = arith.constant 0 : index
    %c0_3 = arith.constant 0 : index
    %3 = vector.load %arg3[%c0_2, %c0_3] : memref<128x16xbf16, #tpu.memory_space<vmem>>, vector<128x16xbf16>
    %c0_4 = arith.constant 0 : index
    %c0_5 = arith.constant 0 : index
    %4 = vector.load %arg4[%c0_4, %c0_5] : memref<128x1xf32, #tpu.memory_space<vmem>>, vector<128x1xf32>
    %cst = arith.constant dense<0.000000e+00> : vector<128x128xf32>
    %5 = tpu.matmul %3, %2, %cst {dimension_numbers = #tpu.dot_dimension_numbers<[1], [0], [0], [1], [0, 0, 1, 1], [], []>} : vector<128x16xbf16>, vector<16x128xbf16>, vector<128x128xf32> -> vector<128x128xf32>
    %6 = vector.broadcast %4 : vector<128x1xf32> to vector<128x128xf32>
    %7 = arith.addf %5, %6 : vector<128x128xf32>
    %cst_6 = arith.constant 0.000000e+00 : f32
    %8 = vector.broadcast %cst_6 : f32 to vector<128x128xf32>
    %9 = arith.maximumf %7, %8 : vector<128x128xf32>
    %10 = arith.truncf %9 : vector<128x128xf32> to vector<128x128xbf16>
    %c0_7 = arith.constant 0 : index
    %c0_8 = arith.constant 0 : index
    %11 = vector.load %arg5[%c0_7, %c0_8] : memref<64x128xbf16, #tpu.memory_space<vmem>>, vector<64x128xbf16>
    %c0_9 = arith.constant 0 : index
    %c0_10 = arith.constant 0 : index
    %12 = vector.load %arg6[%c0_9, %c0_10] : memref<64x1xf32, #tpu.memory_space<vmem>>, vector<64x1xf32>
    %cst_11 = arith.constant dense<0.000000e+00> : vector<64x128xf32>
    %13 = tpu.matmul %11, %10, %cst_11 {dimension_numbers = #tpu.dot_dimension_numbers<[1], [0], [0], [1], [0, 0, 1, 1], [], []>} : vector<64x128xbf16>, vector<128x128xbf16>, vector<64x128xf32> -> vector<64x128xf32>
    %14 = vector.broadcast %12 : vector<64x1xf32> to vector<64x128xf32>
    %15 = arith.addf %13, %14 : vector<64x128xf32>
    %cst_12 = arith.constant 0.000000e+00 : f32
    %16 = vector.broadcast %cst_12 : f32 to vector<64x128xf32>
    %17 = arith.maximumf %15, %16 : vector<64x128xf32>
    %18 = arith.truncf %17 : vector<64x128xf32> to vector<64x128xbf16>
    %c0_13 = arith.constant 0 : index
    %c0_14 = arith.constant 0 : index
    %19 = vector.load %arg7[%c0_13, %c0_14] : memref<4x64xbf16, #tpu.memory_space<vmem>>, vector<4x64xbf16>
    %c0_15 = arith.constant 0 : index
    %c0_16 = arith.constant 0 : index
    %20 = vector.load %arg8[%c0_15, %c0_16] : memref<4x1xf32, #tpu.memory_space<vmem>>, vector<4x1xf32>
    %cst_17 = arith.constant dense<0.000000e+00> : vector<4x128xf32>
    %21 = tpu.matmul %19, %18, %cst_17 {dimension_numbers = #tpu.dot_dimension_numbers<[1], [0], [0], [1], [0, 0, 1, 1], [], []>} : vector<4x64xbf16>, vector<64x128xbf16>, vector<4x128xf32> -> vector<4x128xf32>
    %22 = vector.broadcast %20 : vector<4x1xf32> to vector<4x128xf32>
    %23 = arith.addf %21, %22 : vector<4x128xf32>
    %c0_18 = arith.constant 0 : index
    %c0_19 = arith.constant 0 : index
    %c0_20 = arith.constant 0 : index
    %24 = vector.load %arg9[%c0_18, %c0_19, %c0_20] : memref<1x4x128xf32, #tpu.memory_space<vmem>>, vector<1x4x128xf32>
    %25 = vector.shape_cast %24 : vector<1x4x128xf32> to vector<4x128xf32>
    %26 = vector.shape_cast %23 : vector<4x128xf32> to vector<1x4x128xf32>
    tpu.vector_store %arg9[%c0_18, %c0_19, %c0_20], %26 {strides = array<i32>} : memref<1x4x128xf32, #tpu.memory_space<vmem>>, vector<1x4x128xf32>,
    return
  }
  func.func @transform_0(%arg0: i32, %arg1: i32) -> (i32, i32, i32) {
    %c0_i32 = arith.constant 0 : i32
    %c0_i32_0 = arith.constant 0 : i32
    return %arg0, %c0_i32, %arg1 : i32, i32, i32
  }
  func.func @transform_1(%arg0: i32, %arg1: i32) -> (i32, i32) {
    %c0_i32 = arith.constant 0 : i32
    %c0_i32_0 = arith.constant 0 : i32
    %c0_i32_1 = arith.constant 0 : i32
    return %c0_i32, %c0_i32_0 : i32, i32
  }
  func.func @transform_2(%arg0: i32, %arg1: i32) -> (i32, i32) {
    %c0_i32 = arith.constant 0 : i32
    %c0_i32_0 = arith.constant 0 : i32
    %c0_i32_1 = arith.constant 0 : i32
    return %c0_i32, %c0_i32_0 : i32, i32
  }
  func.func @transform_3(%arg0: i32, %arg1: i32) -> (i32, i32) {
    %c0_i32 = arith.constant 0 : i32
    %c0_i32_0 = arith.constant 0 : i32
    %c0_i32_1 = arith.constant 0 : i32
    return %c0_i32, %c0_i32_0 : i32, i32
  }
  func.func @transform_4(%arg0: i32, %arg1: i32) -> (i32, i32) {
    %c0_i32 = arith.constant 0 : i32
    %c0_i32_0 = arith.constant 0 : i32
    %c0_i32_1 = arith.constant 0 : i32
    return %c0_i32, %c0_i32_0 : i32, i32
  }
  func.func @transform_5(%arg0: i32, %arg1: i32) -> (i32, i32) {
    %c0_i32 = arith.constant 0 : i32
    %c0_i32_0 = arith.constant 0 : i32
    %c0_i32_1 = arith.constant 0 : i32
    return %c0_i32, %c0_i32_0 : i32, i32
  }
  func.func @transform_6(%arg0: i32, %arg1: i32) -> (i32, i32) {
    %c0_i32 = arith.constant 0 : i32
    %c0_i32_0 = arith.constant 0 : i32
    %c0_i32_1 = arith.constant 0 : i32
    return %c0_i32, %c0_i32_0 : i32, i32
  }
  func.func @transform_7(%arg0: i32, %arg1: i32) -> (i32, i32, i32) {
    %c0_i32 = arith.constant 0 : i32
    %c0_i32_0 = arith.constant 0 : i32
    return %arg0, %c0_i32, %arg1 : i32, i32, i32
  }
}

</mosaic_0001>

<bundles_post_ra>
// kernel: decoder_forward.1
= control target key start
LH: loop header
LB: loop body
LE: loop exit
PB: predicated region body
PF: predicated region fallthrough
CT: control target
= control target key end

     0   :  { %s1078_s24 = smov 0   ;;  %s1080_s25 = smov 0   ;;  %s1297_s0 = inlined_call_operand.vmem [shape: f32[2,16,256], index: 0, kind: input, shape index: {}]   ;;  %s1298_s1 = inlined_call_operand.vmem [shape: bf16[128,16], index: 1, kind: input, shape index: {}]   ;;  %s1299_s2 = inlined_call_operand.vmem [shape: f32[128,1], index: 2, kind: input, shape index: {}]   ;;  %s1300_s3 = inlined_call_operand.vmem [shape: bf16[64,128], index: 3, kind: input, shape index: {}]   ;;  %s1301_s4 = inlined_call_operand.vmem [shape: f32[64,1], index: 4, kind: input, shape index: {}]   ;;  %s1302_s5 = inlined_call_operand.vmem [shape: bf16[4,64], index: 5, kind: input, shape index: {}]   ;;  %s1303_s6 = inlined_call_operand.vmem [shape: f32[4,1], index: 6, kind: input, shape index: {}]   ;;  %s1304_s7 = inlined_call_operand.vmem [shape: f32[2,4,256], index: 7, kind: output, shape index: {}]  }
   0x1   :  { %s1082_s26 = smov 0   ;;  %s1084_s27 = smov 0  }
   0x2   :  { %s1086_s28 = smov 0   ;;  %s1088_s29 = smov 0  }
   0x3   :  { %s1090_s30 = smov 0  }
   0x4 LB: > { %s26_s8 = sadd.s32 1, %s1027_s28  ;;  %s29_s9 = sadd.s32 1, %s1031_s29  ;;  %s1035_s30 = sphi %s1090_s30, %s17_s30   ;;  %s1031_s29 = sphi %s1088_s29, %s1310_s29   ;;  %s1027_s28 = sphi %s1086_s28, %s1309_s28   ;;  %s1023_s27 = sphi %s1084_s27, %s1308_s27   ;;  %s1019_s26 = sphi %s1082_s26, %s1307_s26   ;;  %s1015_s25 = sphi %s1080_s25, %s1306_s25   ;;  %s1011_s24 = sphi %s1078_s24, %s1305_s24  }
   0x5   : > { %p27_p0 = scmp.ge.s32.totalorder %s26_s8, 2  ;;  %p45_p1 = scmp.ne.s32.totalorder %s1015_s25, %s1011_s24 }
   0x6   : > { %p46_p2 = scmp.eq.s32.totalorder %s1035_s30, 0  ;;  %s38_s13 = sadd.s32 1, %s1015_s25 }
   0x7   : > { %s1312_s8 = smov (%p27_p0, %s26_s8), 0  ;;  %s1314_s9 = smov (!%p27_p0, %s29_s9), %s1031_s29 }
   0x8   : > { %p47_p3 = por %p46_p2, %p45_p1  ;;  %p31_p4 = scmp.ge.s32.totalorder %s1314_s9, 2 }
   0x9   : > { %s34_s10 = ssub.s32 %s1027_s28, %s1312_s8  ;;  %p833_p6 = scmp.ge.s32.totalorder %s1035_s30, 4 }
   0xa   : > { %s1316_s9 = smov (%p31_p4, %s1314_s9), 0 }
   0xb   : > { %s33_s11 = ssub.s32 %s1031_s29, %s1316_s9  ;;  %243 = sbr.rel (%p833_p6) target bundleno = 24 (0x18), region = 40 }
   0xc   : > { %s35_s12 = sor.u32 %s34_s10, %s33_s11 }
   0xd   : > { %p36_p5 = scmp.eq.s32.totalorder %s35_s12, 0 }
   0xf   : > { %s1129_s14 = scalar_select %p36_p5, %s1015_s25, %s38_s13  }
  0x10   : > { %246 = sbr.rel (!%p47_p3) target bundleno = 24 (0x18), region = 44  ;;  %s248_s15 = sand.u32 (%p47_p3), 1, %s1015_s25  }
  0x11   : > { %s835_s16 = sshll.u32 (%p47_p3), %s1031_s29, 2  ;;  %s834_s17 = sshll.u32 (%p47_p3), %s248_s15, 4 }
  0x12   : > { %s252_s18 = sadd.s32 (%p47_p3), %s1027_s28, %s835_s16  ;;  %s250_s23 = scalar_lea.vmem (%p47_p3), [#allocation2], %s834_s17 }
  0x13   : > { %s836_s19 = sshll.u32 (%p47_p3), %s252_s18, 3 }
  0x14   : > { %s254_s22 = scalar_lea.vmem (%p47_p3), %s1297_s0, %s836_s19 }
  0x15   : > { %v285_v0 = vld [vmem:[%s254_s22] sm:$0xff]  ;;  %v287_v1 = vld [vmem:[%s254_s22 + $0x10] sm:$0xff] }
  0x16   : > { %286 = vst [vmem:[%s250_s23] sm:$0xff] %v285_v0 }
  0x17   : > { %288 = vst [vmem:[%s250_s23 + $0x8] sm:$0xff] %v287_v1 }
  0x18 PF: > { %p837_p7 = scmp.ge.s32.totalorder %s1035_s30, 1  ;;  %p293_p8 = scmp.lt.s32.totalorder %s1035_s30, 5 }
  0x1a   : > { %p294_p9 = pnand %p837_p7, %p293_p8 }
  0x1b   : > { %s300_s12 = sand.u32 (!%p294_p9), 1, %s1011_s24   ;;  %p334_p10 = scmp.lt.s32.totalorder (!%p294_p9), %s1023_s27, 1 }
  0x1c   : > { %297 = sbr.rel (%p294_p9) target bundleno = 589 (0x24d), region = 82  ;;  %s838_s13 = sshll.u32 (!%p294_p9), %s300_s12, 4 }
  0x1d   : > { %s302_s17 = scalar_lea.vmem (!%p294_p9), [#allocation2], %s838_s13  ;;  %p336_p11 = scmp.lt.s32.totalorder (!%p294_p9), %s1019_s26, 1 }
  0x21   : > { %v376_v2 = vld [vmem:[%s1299_s2 + $0x70] sm:$0xff]  ;;  %v1037_v3 = vmov 0   ;;  %v374_v4 = vld [vmem:[%s1299_s2 + $0x60] sm:$0xff]  ;;  %v344_v6 = vld [vmem:[%s302_s17 + $0x8] sm:$0xff]  ;;  %vm498_vm0 = vcmask 130048   ;;  %vm724_vm1 = vcmask 523264  }
  0x22   : > { %978 = vset.pattern.permute.xlu0 %v1037_v3  ;;  %979 = vset.pattern.permute.xlu1 %v1037_v3  ;;  %v343_v5 = vld [vmem:[%s302_s17] sm:$0xff]  ;;  %v377_v11 = vld [vmem:[%s1299_s2 + $0x78] sm:$0xff]  ;;  %v375_v12 = vld [vmem:[%s1299_s2 + $0x68] sm:$0xff]  ;;  %s1318_s27 = smov (!%p334_p10, %s1023_s27), 1  ;;  %s1320_s26 = smov (!%p336_p11, %s1019_s26), 1 }
  0x23   : > { %450 = vperm.xlu0 %978, %v376_v2   ;;  %440 = vperm.xlu1 %979, %v374_v4   ;;  %v345_v7 = vpack.c.bf16 %v344_v6, %v343_v5  ;;  %v372_v8 = vld [vmem:[%s1299_s2 + $0x50] sm:$0xff]  ;;  %v900_v9 = vld [vmem:[%s1298_s1] sm:$0xff]  ;;  %v373_v13 = vld [vmem:[%s1299_s2 + $0x58] sm:$0xff]  ;;  %s839_s24 = sshll.u32 %s1318_s27, 1 }
  0x24   : > { %980 = vset.pattern.permute.xlu2 %v1037_v3  ;;  %v904_v10 = vld [vmem:[%s1298_s1 + $0x20] sm:$0xff]  ;;  %v371_v15 = vld [vmem:[%s1299_s2 + $0x48] sm:$0xff]  ;;  %v368_v16 = vld [vmem:[%s1299_s2 + $0x30] sm:$0xff]  ;;  %s339_s20 = sadd.s32 %s839_s24, %s1320_s26 }
  0x25   : > { %430 = vperm.xlu2 %980, %v372_v8   ;;  %530 = vmatpush.bf16.msra.mxu0 %v345_v7  ;;  %v370_v14 = vld [vmem:[%s1299_s2 + $0x40] sm:$0xff]  ;;  %v901_v17 = vld [vmem:[%s1298_s1 + $0x8] sm:$0xff]  ;;  %v369_v19 = vld [vmem:[%s1299_s2 + $0x38] sm:$0xff]  ;;  %s840_s21 = sshll.u32 %s339_s20, 2 }
  0x26   : > { %912 = vmatpush.bf16.msra.mxu3 %v345_v7  ;;  %v905_v18 = vld [vmem:[%s1298_s1 + $0x28] sm:$0xff]  ;;  %v366_v20 = vld [vmem:[%s1299_s2 + $0x20] sm:$0xff]  ;;  %v364_v22 = vld [vmem:[%s1299_s2 + $0x10] sm:$0xff]  ;;  %s341_s10 = scalar_lea.vmem %s1304_s7, %s840_s21 }
  0x27   : > { %v367_v21 = vld [vmem:[%s1299_s2 + $0x28] sm:$0xff]  ;;  %v365_v23 = vld [vmem:[%s1299_s2 + $0x18] sm:$0xff]  ;;  %v362_v24 = vld [vmem:[%s1299_s2] sm:$0xff] }
  0x28   : > { %873 = vmatmul.msk.bf16.vlgmr.msra.gmra.mxu0 %vm498_vm0, %v900_v9  ;;  %v902_v25 = vld [vmem:[%s1298_s1 + $0x10] sm:$0xff]  ;;  %v363_v27 = vld [vmem:[%s1299_s2 + $0x8] sm:$0xff]  ;;  %v611_v29 = vld [vmem:[%s1301_s4 + $0x38] sm:$0xff] }
  0x29   : > { %877 = vmatmul.msk.bf16.vlgmr.msra.gmra.mxu3 %vm498_vm0, %v904_v10  ;;  %v906_v26 = vld [vmem:[%s1298_s1 + $0x30] sm:$0xff]  ;;  %v608_v30 = vld [vmem:[%s1301_s4 + $0x20] sm:$0xff]  ;;  %v609_v31 = vld [vmem:[%s1301_s4 + $0x28] sm:$0xff] }
  0x2a   : > { %v610_v28 = vld [vmem:[%s1301_s4 + $0x30] sm:$0xff]  ;;  %v903_v33 = vld [vmem:[%s1298_s1 + $0x18] sm:$0xff]  ;;  %v604_v36 = vld [vmem:[%s1301_s4] sm:$0xff] }
  0x2b   : > { %455 = vperm.xlu0 %978, %v377_v11   ;;  %445 = vperm.xlu1 %979, %v375_v12   ;;  %v606_v32 = vld [vmem:[%s1301_s4 + $0x10] sm:$0xff]  ;;  %v907_v34 = vld [vmem:[%s1298_s1 + $0x38] sm:$0xff]  ;;  %v605_v37 = vld [vmem:[%s1301_s4 + $0x8] sm:$0xff] }
  0x2c   : > { %v607_v35 = vld [vmem:[%s1301_s4 + $0x18] sm:$0xff]  ;;  %v718_v38 = vld [vmem:[%s1303_s6] sm:$0xf] }
  0x2d   : > { %435 = vperm.xlu2 %980, %v373_v13  }
  0x33   : > { %420 = vperm.xlu0 %978, %v370_v14   ;;  %425 = vperm.xlu1 %979, %v371_v15  }
  0x35   : > { %410 = vperm.xlu2 %980, %v368_v16  }
  0x38   : > { %874 = vmatmul.msk.bf16.gmra.mxu0 %vm498_vm0, %v901_v17 }
  0x39   : > { %878 = vmatmul.msk.bf16.gmra.mxu3 %vm498_vm0, %v905_v18 }
  0x3b   : > { %415 = vperm.xlu0 %978, %v369_v19   ;;  %400 = vperm.xlu1 %979, %v366_v20  }
  0x3d   : > { %405 = vperm.xlu2 %980, %v367_v21  }
  0x43   : > { %390 = vperm.xlu0 %978, %v364_v22   ;;  %395 = vperm.xlu1 %979, %v365_v23  }
  0x45   : > { %380 = vperm.xlu2 %980, %v362_v24  }
  0x48   : > { %875 = vmatmul.msk.bf16.gmra.mxu0 %vm498_vm0, %v902_v25 }
  0x49   : > { %879 = vmatmul.msk.bf16.gmra.mxu3 %vm498_vm0, %v906_v26 }
  0x4b   : > { %385 = vperm.xlu0 %978, %v363_v27   ;;  %644 = vperm.xlu1 %979, %v610_v28  }
  0x4d   : > { %649 = vperm.xlu2 %980, %v611_v29  }
  0x53   : > { %634 = vperm.xlu0 %978, %v608_v30   ;;  %639 = vperm.xlu1 %979, %v609_v31  }
  0x55   : > { %624 = vperm.xlu2 %980, %v606_v32  }
  0x58   : > { %876 = vmatmul.msk.bf16.gmra.mxu0 %vm498_vm0, %v903_v33 }
  0x59   : > { %880 = vmatmul.msk.bf16.gmra.mxu3 %vm498_vm0, %v907_v34 }
  0x5b   : > { %629 = vperm.xlu0 %978, %v607_v35   ;;  %614 = vperm.xlu1 %979, %v604_v36  }
  0x5d   : > { %619 = vperm.xlu2 %980, %v605_v37  }
  0x63   : > { %721 = vperm.xlu0 %978, %v718_v38  }
  0x7f   : > { %v431_v51 = vpop.permute.xlu2 %430 }
  0x87   : > { %v436_v56 = vpop.permute.xlu2 %435 }
  0x8f   : > { %v411_v63 = vpop.permute.xlu2 %410 }
  0x95   : > { %v451_v47 = vpop.permute.xlu0 %450  ;;  %v441_v49 = vpop.permute.xlu1 %440 }
  0x97   : > { %v406_v17 = vpop.permute.xlu2 %405 }
  0x9d   : > { %v456_v52 = vpop.permute.xlu0 %455  ;;  %v446_v54 = vpop.permute.xlu1 %445 }
  0x9f   : > { %v381_v32 = vpop.permute.xlu2 %380 }
  0xa5   : > { %v1248_v39 = vpop.f32.mrf.mxu0  ;;  %v421_v57 = vpop.permute.xlu0 %420 }
  0xa6   : > { %v426_v59 = vpop.permute.xlu1 %425  ;;  %v533_v38 = vadd.f32 %v1248_v39, %v381_v32  ;;  %v911_v39 = vld [vmem:[%s1300_s3 + $0x18] sm:$0xff] }
  0xac   : > { %v552_v40 = vpop.f32.mrf.mxu3 }
  0xad   : > { %v1250_v41 = vpop.f32.mrf.mxu0  ;;  %v416_v2 = vpop.permute.xlu0 %415  ;;  %v553_v14 = vadd.f32 %v552_v40, %v421_v57 }
  0xae   : > { %v401_v15 = vpop.permute.xlu1 %400 }
  0xaf   : > { %v580_v24 = vmax.f32 %v553_v14, 0.0 }
  0xb4   : > { %v554_v42 = vpop.f32.mrf.mxu3 }
  0xb5   : > { %v537_v43 = vpop.f32.mrf.mxu0  ;;  %v555_v11 = vadd.f32 %v554_v42, %v426_v59  ;;  %v391_v19 = vpop.permute.xlu0 %390 }
  0xb6   : > { %v538_v30 = vadd.f32 %v537_v43, %v391_v19  ;;  %v396_v31 = vpop.permute.xlu1 %395  ;;  %v572_v43 = vmax.f32 %v533_v38, 0.0 }
  0xb7   : > { %v581_v20 = vmax.f32 %v555_v11, 0.0 }
  0xb8   : > { %v574_v40 = vmax.f32 %v538_v30, 0.0 }
  0xb9   : > { %v592_v25 = vpack.c.bf16 %v581_v20, %v580_v24 }
  0xbc   : > { %v557_v44 = vpop.f32.mrf.mxu3 }
  0xbd   : > { %v539_v46 = vpop.f32.mrf.mxu0  ;;  %v558_v9 = vadd.f32 %v557_v44, %v431_v51  ;;  %v386_v37 = vpop.permute.xlu0 %385 }
  0xbe   : > { %v540_v33 = vadd.f32 %v539_v46, %v396_v31  ;;  %v535_v42 = vadd.f32 %v1250_v41, %v386_v37  ;;  %v909_v41 = vld [vmem:[%s1300_s3 + $0x8] sm:$0xff] }
  0xbf   : > { %v582_v18 = vmax.f32 %v558_v9, 0.0 }
  0xc0   : > { %v575_v44 = vmax.f32 %v540_v33, 0.0 }
  0xc4   : > { %v559_v45 = vpop.f32.mrf.mxu3 }
  0xc5   : > { %v542_v50 = vpop.f32.mrf.mxu0  ;;  %v560_v6 = vadd.f32 %v559_v45, %v436_v56  ;;  %v650_v56 = vpop.permute.xlu2 %649 }
  0xc6   : > { %v543_v26 = vadd.f32 %v542_v50, %v401_v15  ;;  %v910_v50 = vld [vmem:[%s1300_s3 + $0x10] sm:$0xff] }
  0xc7   : > { %v583_v12 = vmax.f32 %v560_v6, 0.0 }
  0xc8   : > { %v576_v34 = vmax.f32 %v543_v26, 0.0 }
  0xc9   : > { %v593_v23 = vpack.c.bf16 %v583_v12, %v582_v18 }
  0xcc   : > { %v562_v48 = vpop.f32.mrf.mxu3 }
  0xcd   : > { %v544_v55 = vpop.f32.mrf.mxu0  ;;  %v563_v3 = vadd.f32 %v562_v48, %v441_v49  ;;  %v589_v48 = vpack.c.bf16 %v575_v44, %v574_v40  ;;  %v908_v49 = vld [vmem:[%s1300_s3] sm:$0xff] }
  0xce   : > { %v545_v27 = vadd.f32 %v544_v55, %v406_v17 }
  0xcf   : > { %v584_v10 = vmax.f32 %v563_v3, 0.0 }
  0xd0   : > { %v577_v35 = vmax.f32 %v545_v27, 0.0 }
  0xd2   : > { %v590_v45 = vpack.c.bf16 %v577_v35, %v576_v34 }
  0xd4   : > { %v564_v53 = vpop.f32.mrf.mxu3 }
  0xd5   : > { %v547_v61 = vpop.f32.mrf.mxu0  ;;  %v565_v0 = vadd.f32 %v564_v53, %v446_v54  ;;  %v645_v54 = vpop.permute.xlu1 %644 }
  0xd6   : > { %v548_v21 = vadd.f32 %v547_v61, %v411_v63 }
  0xd7   : > { %v585_v7 = vmax.f32 %v565_v0, 0.0  ;;  %v635_v0 = vpop.permute.xlu0 %634 }
  0xd8   : > { %v578_v28 = vmax.f32 %v548_v21, 0.0 }
  0xd9   : > { %v594_v13 = vpack.c.bf16 %v585_v7, %v584_v10 }
  0xdc   : > { %v567_v58 = vpop.f32.mrf.mxu3 }
  0xdd   : > { %v568_v60 = vadd.f32 %v567_v58, %v451_v47  ;;  %v549_v16 = vpop.f32.mrf.mxu0  ;;  %v573_v47 = vmax.f32 %v535_v42, 0.0  ;;  %v640_v3 = vpop.permute.xlu1 %639 }
  0xde   : > { %v550_v22 = vadd.f32 %v549_v16, %v416_v2  ;;  %v625_v2 = vpop.permute.xlu2 %624 }
  0xdf   : > { %v586_v4 = vmax.f32 %v568_v60, 0.0  ;;  %v588_v46 = vpack.c.bf16 %v573_v47, %v572_v43 }
  0xe0   : > { %v579_v29 = vmax.f32 %v550_v22, 0.0 }
  0xe2   : > { %v591_v36 = vpack.c.bf16 %v579_v29, %v578_v28 }
  0xe4   : > { %v569_v62 = vpop.f32.mrf.mxu3 }
  0xe5   : > { %v570_v1 = vadd.f32 %v569_v62, %v456_v52  ;;  %v615_v16 = vpop.permute.xlu1 %614 }
  0xe6   : > { %v620_v12 = vpop.permute.xlu2 %619 }
  0xe7   : > { %v587_v5 = vmax.f32 %v570_v1, 0.0 }
  0xe9   : > { %v595_v8 = vpack.c.bf16 %v587_v5, %v586_v4  ;;  %v630_v5 = vpop.permute.xlu0 %629 }
  0xeb   : > { %676 = vmatpush.bf16.msra.mxu1 %v595_v8  ;;  %913 = vmatpush.bf16.msra.mxu2 %v595_v8 }
  0xef   : > { %677 = vmatpush.bf16.msra.mxu1 %v594_v13  ;;  %914 = vmatpush.bf16.msra.mxu2 %v594_v13 }
  0xf1   : > { %v722_v24 = vpop.permute.xlu0 %721 }
  0xf3   : > { %678 = vmatpush.bf16.msra.mxu1 %v593_v23  ;;  %915 = vmatpush.bf16.msra.mxu2 %v593_v23  ;;  %v717_v23 = vld [vmem:[%s1302_s5] sm:$0x3] }
  0xf7   : > { %679 = vmatpush.bf16.msra.mxu1 %v592_v25  ;;  %916 = vmatpush.bf16.msra.mxu2 %v592_v25 }
  0xfb   : > { %680 = vmatpush.bf16.msra.mxu1 %v591_v36  ;;  %917 = vmatpush.bf16.msra.mxu2 %v591_v36 }
  0xff   : > { %681 = vmatpush.bf16.msra.mxu1 %v590_v45  ;;  %918 = vmatpush.bf16.msra.mxu2 %v590_v45 }
 0x103   : > { %682 = vmatpush.bf16.msra.mxu1 %v589_v48  ;;  %919 = vmatpush.bf16.msra.mxu2 %v589_v48 }
 0x107   : > { %683 = vmatpush.bf16.msra.mxu1 %v588_v46  ;;  %920 = vmatpush.bf16.msra.mxu2 %v588_v46 }
 0x10a   : > { %684 = vmatmul.bf16.vlgmr.msra.gmra.mxu1 %v908_v49  ;;  %699 = vmatmul.bf16.vlgmr.msra.gmra.mxu2 %v911_v39 }
 0x11a   : > { %689 = vmatmul.bf16.gmra.mxu1 %v909_v41 }
 0x12a   : > { %694 = vmatmul.bf16.gmra.mxu1 %v910_v50 }
 0x187   : > { %v685_v51 = vpop.f32.mrf.mxu1 }
 0x188   : > { %v686_v17 = vadd.f32 %v685_v51, %v615_v16 }
 0x18a   : > { %v705_v21 = vmax.f32 %v686_v17, 0.0 }
 0x18d   : > { %v700_v52 = vpop.f32.mrf.mxu2 }
 0x18e   : > { %v701_v55 = vadd.f32 %v700_v52, %v645_v54 }
 0x18f   : > { %v687_v53 = vpop.f32.mrf.mxu1 }
 0x190   : > { %v711_v60 = vmax.f32 %v701_v55, 0.0  ;;  %v688_v13 = vadd.f32 %v687_v53, %v620_v12 }
 0x192   : > { %v706_v19 = vmax.f32 %v688_v13, 0.0 }
 0x194   : > { %v713_v22 = vpack.c.bf16 %v706_v19, %v705_v21 }
 0x195   : > { %v702_v57 = vpop.f32.mrf.mxu2 }
 0x196   : > { %v703_v58 = vadd.f32 %v702_v57, %v650_v56 }
 0x197   : > { %v690_v59 = vpop.f32.mrf.mxu1 }
 0x198   : > { %v712_v61 = vmax.f32 %v703_v58, 0.0  ;;  %v691_v9 = vadd.f32 %v690_v59, %v625_v2 }
 0x19a   : > { %v716_v62 = vpack.c.bf16 %v712_v61, %v711_v60  ;;  %v707_v18 = vmax.f32 %v691_v9, 0.0 }
 0x19c   : > { %732 = vmatpush.bf16.msrb.mxu2 %v716_v62 }
 0x19f   : > { %v692_v63 = vpop.f32.mrf.mxu1 }
 0x1a0   : > { %v693_v7 = vadd.f32 %v692_v63, %v630_v5 }
 0x1a2   : > { %v708_v14 = vmax.f32 %v693_v7, 0.0 }
 0x1a4   : > { %v714_v20 = vpack.c.bf16 %v708_v14, %v707_v18 }
 0x1a7   : > { %v695_v1 = vpop.f32.mrf.mxu1 }
 0x1a8   : > { %v696_v4 = vadd.f32 %v695_v1, %v635_v0 }
 0x1aa   : > { %v709_v10 = vmax.f32 %v696_v4, 0.0 }
 0x1af   : > { %v697_v6 = vpop.f32.mrf.mxu1 }
 0x1b0   : > { %v698_v8 = vadd.f32 %v697_v6, %v640_v3 }
 0x1b2   : > { %v710_v11 = vmax.f32 %v698_v8, 0.0 }
 0x1b4   : > { %v715_v15 = vpack.c.bf16 %v710_v11, %v709_v10 }
 0x1b6   : > { %733 = vmatpush.bf16.msrb.mxu2 %v715_v15 }
 0x1ba   : > { %734 = vmatpush.bf16.msrb.mxu2 %v714_v20 }
 0x1be   : > { %735 = vmatpush.bf16.msrb.mxu2 %v713_v22 }
 0x1c1   : > { %897 = vmatmul.msk.bf16.vlgmr.msrb.gmra.mxu2 %vm724_vm1, %v717_v23 }
 0x244   : > { %v737_v25 = vpop.f32.mrf.mxu2 }
 0x245   : > { %v738_v26 = vadd.f32 %v737_v25, %v722_v24 }
 0x247   : > { %741 = vst [vmem:[%s341_s10] sm:$0xf] %v738_v26 }
 0x24c   : > { %v739_v27 = vpop.f32.mrf.mxu2 }
 0x24d PF: > { %s17_s30 = sadd.s32 1, %s1035_s30   ;;  %s1305_s24 = smov %s1015_s25 }
 0x24e   : > { %p14_p12 = scmp.ge.s32.totalorder %s17_s30, 6   ;;  %s1306_s25 = smov %s1129_s14 }
 0x24f   : > { %s1307_s26 = smov %s1027_s28  ;;  %s1308_s27 = smov %s1031_s29 }
 0x250   : > { %s1309_s28 = smov %s1312_s8  ;;  %s1310_s29 = smov %s1316_s9 }
 0x251   :  { %16 = sbr.rel (!%p14_p12) target bundleno = 4 (0x4), region = 121 }

// kernel: decoder_forward.1
= control target key start
LH: loop header
LB: loop body
LE: loop exit
PB: predicated region body
PF: predicated region fallthrough
CT: control target
= control target key end

     0   :  { %s1078_s24 = smov 0   ;;  %s1080_s25 = smov 0   ;;  %s1297_s0 = inlined_call_operand.vmem [shape: f32[2,16,256], index: 0, kind: input, shape index: {}]   ;;  %s1298_s1 = inlined_call_operand.vmem [shape: bf16[128,16], index: 1, kind: input, shape index: {}]   ;;  %s1299_s2 = inlined_call_operand.vmem [shape: f32[128,1], index: 2, kind: input, shape index: {}]   ;;  %s1300_s3 = inlined_call_operand.vmem [shape: bf16[64,128], index: 3, kind: input, shape index: {}]   ;;  %s1301_s4 = inlined_call_operand.vmem [shape: f32[64,1], index: 4, kind: input, shape index: {}]   ;;  %s1302_s5 = inlined_call_operand.vmem [shape: bf16[4,64], index: 5, kind: input, shape index: {}]   ;;  %s1303_s6 = inlined_call_operand.vmem [shape: f32[4,1], index: 6, kind: input, shape index: {}]   ;;  %s1304_s7 = inlined_call_operand.vmem [shape: f32[2,4,256], index: 7, kind: output, shape index: {}]  }
   0x1   :  { %s1082_s26 = smov 0   ;;  %s1084_s27 = smov 0  }
   0x2   :  { %s1086_s28 = smov 0   ;;  %s1088_s29 = smov 0  }
   0x3   :  { %s1090_s30 = smov 0  }
   0x4 LB: > { %s26_s8 = sadd.s32 1, %s1027_s28  ;;  %s29_s9 = sadd.s32 1, %s1031_s29  ;;  %s1035_s30 = sphi %s1090_s30, %s17_s30   ;;  %s1031_s29 = sphi %s1088_s29, %s1310_s29   ;;  %s1027_s28 = sphi %s1086_s28, %s1309_s28   ;;  %s1023_s27 = sphi %s1084_s27, %s1308_s27   ;;  %s1019_s26 = sphi %s1082_s26, %s1307_s26   ;;  %s1015_s25 = sphi %s1080_s25, %s1306_s25   ;;  %s1011_s24 = sphi %s1078_s24, %s1305_s24  }
   0x5   : > { %p27_p0 = scmp.ge.s32.totalorder %s26_s8, 2  ;;  %p45_p1 = scmp.ne.s32.totalorder %s1015_s25, %s1011_s24 }
   0x6   : > { %p46_p2 = scmp.eq.s32.totalorder %s1035_s30, 0  ;;  %s38_s13 = sadd.s32 1, %s1015_s25 }
   0x7   : > { %s1312_s8 = smov (%p27_p0, %s26_s8), 0  ;;  %s1314_s9 = smov (!%p27_p0, %s29_s9), %s1031_s29 }
   0x8   : > { %p47_p3 = por %p46_p2, %p45_p1  ;;  %p31_p4 = scmp.ge.s32.totalorder %s1314_s9, 2 }
   0x9   : > { %s34_s10 = ssub.s32 %s1027_s28, %s1312_s8  ;;  %p833_p6 = scmp.ge.s32.totalorder %s1035_s30, 4 }
   0xa   : > { %s1316_s9 = smov (%p31_p4, %s1314_s9), 0 }
   0xb   : > { %s33_s11 = ssub.s32 %s1031_s29, %s1316_s9  ;;  %243 = sbr.rel (%p833_p6) target bundleno = 24 (0x18), region = 40 }
   0xc   : > { %s35_s12 = sor.u32 %s34_s10, %s33_s11 }
   0xd   : > { %p36_p5 = scmp.eq.s32.totalorder %s35_s12, 0 }
   0xf   : > { %s1129_s14 = scalar_select %p36_p5, %s1015_s25, %s38_s13  }
  0x10   : > { %246 = sbr.rel (!%p47_p3) target bundleno = 24 (0x18), region = 44  ;;  %s248_s15 = sand.u32 (%p47_p3), 1, %s1015_s25  }
  0x11   : > { %s835_s16 = sshll.u32 (%p47_p3), %s1031_s29, 2  ;;  %s834_s17 = sshll.u32 (%p47_p3), %s248_s15, 4 }
  0x12   : > { %s252_s18 = sadd.s32 (%p47_p3), %s1027_s28, %s835_s16  ;;  %s250_s23 = scalar_lea.vmem (%p47_p3), [#allocation2], %s834_s17 }
  0x13   : > { %s836_s19 = sshll.u32 (%p47_p3), %s252_s18, 3 }
  0x14   : > { %s254_s22 = scalar_lea.vmem (%p47_p3), %s1297_s0, %s836_s19 }
  0x15   : > { %v285_v0 = vld [vmem:[%s254_s22] sm:$0xff]  ;;  %v287_v1 = vld [vmem:[%s254_s22 + $0x10] sm:$0xff] }
  0x16   : > { %286 = vst [vmem:[%s250_s23] sm:$0xff] %v285_v0 }
  0x17   : > { %288 = vst [vmem:[%s250_s23 + $0x8] sm:$0xff] %v287_v1 }
  0x18 PF: > { %p837_p7 = scmp.ge.s32.totalorder %s1035_s30, 1  ;;  %p293_p8 = scmp.lt.s32.totalorder %s1035_s30, 5 }
  0x1a   : > { %p294_p9 = pnand %p837_p7, %p293_p8 }
  0x1b   : > { %s300_s12 = sand.u32 (!%p294_p9), 1, %s1011_s24   ;;  %p334_p10 = scmp.lt.s32.totalorder (!%p294_p9), %s1023_s27, 1 }
  0x1c   : > { %297 = sbr.rel (%p294_p9) target bundleno = 589 (0x24d), region = 82  ;;  %s838_s13 = sshll.u32 (!%p294_p9), %s300_s12, 4 }
  0x1d   : > { %s302_s17 = scalar_lea.vmem (!%p294_p9), [#allocation2], %s838_s13  ;;  %p336_p11 = scmp.lt.s32.totalorder (!%p294_p9), %s1019_s26, 1 }
  0x21   : > { %v376_v2 = vld [vmem:[%s1299_s2 + $0x70] sm:$0xff]  ;;  %v1037_v3 = vmov 0   ;;  %v374_v4 = vld [vmem:[%s1299_s2 + $0x60] sm:$0xff]  ;;  %v344_v6 = vld [vmem:[%s302_s17 + $0x8] sm:$0xff]  ;;  %vm498_vm0 = vcmask 130048   ;;  %vm724_vm1 = vcmask 523264  }
  0x22   : > { %978 = vset.pattern.permute.xlu0 %v1037_v3  ;;  %979 = vset.pattern.permute.xlu1 %v1037_v3  ;;  %v343_v5 = vld [vmem:[%s302_s17] sm:$0xff]  ;;  %v377_v11 = vld [vmem:[%s1299_s2 + $0x78] sm:$0xff]  ;;  %v375_v12 = vld [vmem:[%s1299_s2 + $0x68] sm:$0xff]  ;;  %s1318_s27 = smov (!%p334_p10, %s1023_s27), 1  ;;  %s1320_s26 = smov (!%p336_p11, %s1019_s26), 1 }
  0x23   : > { %450 = vperm.xlu0 %978, %v376_v2   ;;  %440 = vperm.xlu1 %979, %v374_v4   ;;  %v345_v7 = vpack.c.bf16 %v344_v6, %v343_v5  ;;  %v372_v8 = vld [vmem:[%s1299_s2 + $0x50] sm:$0xff]  ;;  %v900_v9 = vld [vmem:[%s1298_s1] sm:$0xff]  ;;  %v373_v13 = vld [vmem:[%s1299_s2 + $0x58] sm:$0xff]  ;;  %s839_s24 = sshll.u32 %s1318_s27, 1 }
  0x24   : > { %980 = vset.pattern.permute.xlu2 %v1037_v3  ;;  %v904_v10 = vld [vmem:[%s1298_s1 + $0x20] sm:$0xff]  ;;  %v371_v15 = vld [vmem:[%s1299_s2 + $0x48] sm:$0xff]  ;;  %v368_v16 = vld [vmem:[%s1299_s2 + $0x30] sm:$0xff]  ;;  %s339_s20 = sadd.s32 %s839_s24, %s1320_s26 }
  0x25   : > { %430 = vperm.xlu2 %980, %v372_v8   ;;  %530 = vmatpush.bf16.msra.mxu0 %v345_v7  ;;  %v370_v14 = vld [vmem:[%s1299_s2 + $0x40] sm:$0xff]  ;;  %v901_v17 = vld [vmem:[%s1298_s1 + $0x8] sm:$0xff]  ;;  %v369_v19 = vld [vmem:[%s1299_s2 + $0x38] sm:$0xff]  ;;  %s840_s21 = sshll.u32 %s339_s20, 2 }
  0x26   : > { %912 = vmatpush.bf16.msra.mxu3 %v345_v7  ;;  %v905_v18 = vld [vmem:[%s1298_s1 + $0x28] sm:$0xff]  ;;  %v366_v20 = vld [vmem:[%s1299_s2 + $0x20] sm:$0xff]  ;;  %v364_v22 = vld [vmem:[%s1299_s2 + $0x10] sm:$0xff]  ;;  %s341_s10 = scalar_lea.vmem %s1304_s7, %s840_s21 }
  0x27   : > { %v367_v21 = vld [vmem:[%s1299_s2 + $0x28] sm:$0xff]  ;;  %v365_v23 = vld [vmem:[%s1299_s2 + $0x18] sm:$0xff]  ;;  %v362_v24 = vld [vmem:[%s1299_s2] sm:$0xff] }
  0x28   : > { %873 = vmatmul.msk.bf16.vlgmr.msra.gmra.mxu0 %vm498_vm0, %v900_v9  ;;  %v902_v25 = vld [vmem:[%s1298_s1 + $0x10] sm:$0xff]  ;;  %v363_v27 = vld [vmem:[%s1299_s2 + $0x8] sm:$0xff]  ;;  %v611_v29 = vld [vmem:[%s1301_s4 + $0x38] sm:$0xff] }
  0x29   : > { %877 = vmatmul.msk.bf16.vlgmr.msra.gmra.mxu3 %vm498_vm0, %v904_v10  ;;  %v906_v26 = vld [vmem:[%s1298_s1 + $0x30] sm:$0xff]  ;;  %v608_v30 = vld [vmem:[%s1301_s4 + $0x20] sm:$0xff]  ;;  %v609_v31 = vld [vmem:[%s1301_s4 + $0x28] sm:$0xff] }
  0x2a   : > { %v610_v28 = vld [vmem:[%s1301_s4 + $0x30] sm:$0xff]  ;;  %v903_v33 = vld [vmem:[%s1298_s1 + $0x18] sm:$0xff]  ;;  %v604_v36 = vld [vmem:[%s1301_s4] sm:$0xff] }
  0x2b   : > { %455 = vperm.xlu0 %978, %v377_v11   ;;  %445 = vperm.xlu1 %979, %v375_v12   ;;  %v606_v32 = vld [vmem:[%s1301_s4 + $0x10] sm:$0xff]  ;;  %v907_v34 = vld [vmem:[%s1298_s1 + $0x38] sm:$0xff]  ;;  %v605_v37 = vld [vmem:[%s1301_s4 + $0x8] sm:$0xff] }
  0x2c   : > { %v607_v35 = vld [vmem:[%s1301_s4 + $0x18] sm:$0xff]  ;;  %v718_v38 = vld [vmem:[%s1303_s6] sm:$0xf] }
  0x2d   : > { %435 = vperm.xlu2 %980, %v373_v13  }
  0x33   : > { %420 = vperm.xlu0 %978, %v370_v14   ;;  %425 = vperm.xlu1 %979, %v371_v15  }
  0x35   : > { %410 = vperm.xlu2 %980, %v368_v16  }
  0x38   : > { %874 = vmatmul.msk.bf16.gmra.mxu0 %vm498_vm0, %v901_v17 }
  0x39   : > { %878 = vmatmul.msk.bf16.gmra.mxu3 %vm498_vm0, %v905_v18 }
  0x3b   : > { %415 = vperm.xlu0 %978, %v369_v19   ;;  %400 = vperm.xlu1 %979, %v366_v20  }
  0x3d   : > { %405 = vperm.xlu2 %980, %v367_v21  }
  0x43   : > { %390 = vperm.xlu0 %978, %v364_v22   ;;  %395 = vperm.xlu1 %979, %v365_v23  }
  0x45   : > { %380 = vperm.xlu2 %980, %v362_v24  }
  0x48   : > { %875 = vmatmul.msk.bf16.gmra.mxu0 %vm498_vm0, %v902_v25 }
  0x49   : > { %879 = vmatmul.msk.bf16.gmra.mxu3 %vm498_vm0, %v906_v26 }
  0x4b   : > { %385 = vperm.xlu0 %978, %v363_v27   ;;  %644 = vperm.xlu1 %979, %v610_v28  }
  0x4d   : > { %649 = vperm.xlu2 %980, %v611_v29  }
  0x53   : > { %634 = vperm.xlu0 %978, %v608_v30   ;;  %639 = vperm.xlu1 %979, %v609_v31  }
  0x55   : > { %624 = vperm.xlu2 %980, %v606_v32  }
  0x58   : > { %876 = vmatmul.msk.bf16.gmra.mxu0 %vm498_vm0, %v903_v33 }
  0x59   : > { %880 = vmatmul.msk.bf16.gmra.mxu3 %vm498_vm0, %v907_v34 }
  0x5b   : > { %629 = vperm.xlu0 %978, %v607_v35   ;;  %614 = vperm.xlu1 %979, %v604_v36  }
  0x5d   : > { %619 = vperm.xlu2 %980, %v605_v37  }
  0x63   : > { %721 = vperm.xlu0 %978, %v718_v38  }
  0x7f   : > { %v431_v51 = vpop.permute.xlu2 %430 }
  0x87   : > { %v436_v56 = vpop.permute.xlu2 %435 }
  0x8f   : > { %v411_v63 = vpop.permute.xlu2 %410 }
  0x95   : > { %v451_v47 = vpop.permute.xlu0 %450  ;;  %v441_v49 = vpop.permute.xlu1 %440 }
  0x97   : > { %v406_v17 = vpop.permute.xlu2 %405 }
  0x9d   : > { %v456_v52 = vpop.permute.xlu0 %455  ;;  %v446_v54 = vpop.permute.xlu1 %445 }
  0x9f   : > { %v381_v32 = vpop.permute.xlu2 %380 }
  0xa5   : > { %v1248_v39 = vpop.f32.mrf.mxu0  ;;  %v421_v57 = vpop.permute.xlu0 %420 }
  0xa6   : > { %v426_v59 = vpop.permute.xlu1 %425  ;;  %v533_v38 = vadd.f32 %v1248_v39, %v381_v32  ;;  %v911_v39 = vld [vmem:[%s1300_s3 + $0x18] sm:$0xff] }
  0xac   : > { %v552_v40 = vpop.f32.mrf.mxu3 }
  0xad   : > { %v1250_v41 = vpop.f32.mrf.mxu0  ;;  %v416_v2 = vpop.permute.xlu0 %415  ;;  %v553_v14 = vadd.f32 %v552_v40, %v421_v57 }
  0xae   : > { %v401_v15 = vpop.permute.xlu1 %400 }
  0xaf   : > { %v580_v24 = vmax.f32 %v553_v14, 0.0 }
  0xb4   : > { %v554_v42 = vpop.f32.mrf.mxu3 }
  0xb5   : > { %v537_v43 = vpop.f32.mrf.mxu0  ;;  %v555_v11 = vadd.f32 %v554_v42, %v426_v59  ;;  %v391_v19 = vpop.permute.xlu0 %390 }
  0xb6   : > { %v538_v30 = vadd.f32 %v537_v43, %v391_v19  ;;  %v396_v31 = vpop.permute.xlu1 %395  ;;  %v572_v43 = vmax.f32 %v533_v38, 0.0 }
  0xb7   : > { %v581_v20 = vmax.f32 %v555_v11, 0.0 }
  0xb8   : > { %v574_v40 = vmax.f32 %v538_v30, 0.0 }
  0xb9   : > { %v592_v25 = vpack.c.bf16 %v581_v20, %v580_v24 }
  0xbc   : > { %v557_v44 = vpop.f32.mrf.mxu3 }
  0xbd   : > { %v539_v46 = vpop.f32.mrf.mxu0  ;;  %v558_v9 = vadd.f32 %v557_v44, %v431_v51  ;;  %v386_v37 = vpop.permute.xlu0 %385 }
  0xbe   : > { %v540_v33 = vadd.f32 %v539_v46, %v396_v31  ;;  %v535_v42 = vadd.f32 %v1250_v41, %v386_v37  ;;  %v909_v41 = vld [vmem:[%s1300_s3 + $0x8] sm:$0xff] }
  0xbf   : > { %v582_v18 = vmax.f32 %v558_v9, 0.0 }
  0xc0   : > { %v575_v44 = vmax.f32 %v540_v33, 0.0 }
  0xc4   : > { %v559_v45 = vpop.f32.mrf.mxu3 }
  0xc5   : > { %v542_v50 = vpop.f32.mrf.mxu0  ;;  %v560_v6 = vadd.f32 %v559_v45, %v436_v56  ;;  %v650_v56 = vpop.permute.xlu2 %649 }
  0xc6   : > { %v543_v26 = vadd.f32 %v542_v50, %v401_v15  ;;  %v910_v50 = vld [vmem:[%s1300_s3 + $0x10] sm:$0xff] }
  0xc7   : > { %v583_v12 = vmax.f32 %v560_v6, 0.0 }
  0xc8   : > { %v576_v34 = vmax.f32 %v543_v26, 0.0 }
  0xc9   : > { %v593_v23 = vpack.c.bf16 %v583_v12, %v582_v18 }
  0xcc   : > { %v562_v48 = vpop.f32.mrf.mxu3 }
  0xcd   : > { %v544_v55 = vpop.f32.mrf.mxu0  ;;  %v563_v3 = vadd.f32 %v562_v48, %v441_v49  ;;  %v589_v48 = vpack.c.bf16 %v575_v44, %v574_v40  ;;  %v908_v49 = vld [vmem:[%s1300_s3] sm:$0xff] }
  0xce   : > { %v545_v27 = vadd.f32 %v544_v55, %v406_v17 }
  0xcf   : > { %v584_v10 = vmax.f32 %v563_v3, 0.0 }
  0xd0   : > { %v577_v35 = vmax.f32 %v545_v27, 0.0 }
  0xd2   : > { %v590_v45 = vpack.c.bf16 %v577_v35, %v576_v34 }
  0xd4   : > { %v564_v53 = vpop.f32.mrf.mxu3 }
  0xd5   : > { %v547_v61 = vpop.f32.mrf.mxu0  ;;  %v565_v0 = vadd.f32 %v564_v53, %v446_v54  ;;  %v645_v54 = vpop.permute.xlu1 %644 }
  0xd6   : > { %v548_v21 = vadd.f32 %v547_v61, %v411_v63 }
  0xd7   : > { %v585_v7 = vmax.f32 %v565_v0, 0.0  ;;  %v635_v0 = vpop.permute.xlu0 %634 }
  0xd8   : > { %v578_v28 = vmax.f32 %v548_v21, 0.0 }
  0xd9   : > { %v594_v13 = vpack.c.bf16 %v585_v7, %v584_v10 }
  0xdc   : > { %v567_v58 = vpop.f32.mrf.mxu3 }
  0xdd   : > { %v568_v60 = vadd.f32 %v567_v58, %v451_v47  ;;  %v549_v16 = vpop.f32.mrf.mxu0  ;;  %v573_v47 = vmax.f32 %v535_v42, 0.0  ;;  %v640_v3 = vpop.permute.xlu1 %639 }
  0xde   : > { %v550_v22 = vadd.f32 %v549_v16, %v416_v2  ;;  %v625_v2 = vpop.permute.xlu2 %624 }
  0xdf   : > { %v586_v4 = vmax.f32 %v568_v60, 0.0  ;;  %v588_v46 = vpack.c.bf16 %v573_v47, %v572_v43 }
  0xe0   : > { %v579_v29 = vmax.f32 %v550_v22, 0.0 }
  0xe2   : > { %v591_v36 = vpack.c.bf16 %v579_v29, %v578_v28 }
  0xe4   : > { %v569_v62 = vpop.f32.mrf.mxu3 }
  0xe5   : > { %v570_v1 = vadd.f32 %v569_v62, %v456_v52  ;;  %v615_v16 = vpop.permute.xlu1 %614 }
  0xe6   : > { %v620_v12 = vpop.permute.xlu2 %619 }
  0xe7   : > { %v587_v5 = vmax.f32 %v570_v1, 0.0 }
  0xe9   : > { %v595_v8 = vpack.c.bf16 %v587_v5, %v586_v4  ;;  %v630_v5 = vpop.permute.xlu0 %629 }
  0xeb   : > { %676 = vmatpush.bf16.msra.mxu1 %v595_v8  ;;  %913 = vmatpush.bf16.msra.mxu2 %v595_v8 }
  0xef   : > { %677 = vmatpush.bf16.msra.mxu1 %v594_v13  ;;  %914 = vmatpush.bf16.msra.mxu2 %v594_v13 }
  0xf1   : > { %v722_v24 = vpop.permute.xlu0 %721 }
  0xf3   : > { %678 = vmatpush.bf16.msra.mxu1 %v593_v23  ;;  %915 = vmatpush.bf16.msra.mxu2 %v593_v23  ;;  %v717_v23 = vld [vmem:[%s1302_s5] sm:$0x3] }
  0xf7   : > { %679 = vmatpush.bf16.msra.mxu1 %v592_v25  ;;  %916 = vmatpush.bf16.msra.mxu2 %v592_v25 }
  0xfb   : > { %680 = vmatpush.bf16.msra.mxu1 %v591_v36  ;;  %917 = vmatpush.bf16.msra.mxu2 %v591_v36 }
  0xff   : > { %681 = vmatpush.bf16.msra.mxu1 %v590_v45  ;;  %918 = vmatpush.bf16.msra.mxu2 %v590_v45 }
 0x103   : > { %682 = vmatpush.bf16.msra.mxu1 %v589_v48  ;;  %919 = vmatpush.bf16.msra.mxu2 %v589_v48 }
 0x107   : > { %683 = vmatpush.bf16.msra.mxu1 %v588_v46  ;;  %920 = vmatpush.bf16.msra.mxu2 %v588_v46 }
 0x10a   : > { %684 = vmatmul.bf16.vlgmr.msra.gmra.mxu1 %v908_v49  ;;  %699 = vmatmul.bf16.vlgmr.msra.gmra.mxu2 %v911_v39 }
 0x11a   : > { %689 = vmatmul.bf16.gmra.mxu1 %v909_v41 }
 0x12a   : > { %694 = vmatmul.bf16.gmra.mxu1 %v910_v50 }
 0x187   : > { %v685_v51 = vpop.f32.mrf.mxu1 }
 0x188   : > { %v686_v17 = vadd.f32 %v685_v51, %v615_v16 }
 0x18a   : > { %v705_v21 = vmax.f32 %v686_v17, 0.0 }
 0x18d   : > { %v700_v52 = vpop.f32.mrf.mxu2 }
 0x18e   : > { %v701_v55 = vadd.f32 %v700_v52, %v645_v54 }
 0x18f   : > { %v687_v53 = vpop.f32.mrf.mxu1 }
 0x190   : > { %v711_v60 = vmax.f32 %v701_v55, 0.0  ;;  %v688_v13 = vadd.f32 %v687_v53, %v620_v12 }
 0x192   : > { %v706_v19 = vmax.f32 %v688_v13, 0.0 }
 0x194   : > { %v713_v22 = vpack.c.bf16 %v706_v19, %v705_v21 }
 0x195   : > { %v702_v57 = vpop.f32.mrf.mxu2 }
 0x196   : > { %v703_v58 = vadd.f32 %v702_v57, %v650_v56 }
 0x197   : > { %v690_v59 = vpop.f32.mrf.mxu1 }
 0x198   : > { %v712_v61 = vmax.f32 %v703_v58, 0.0  ;;  %v691_v9 = vadd.f32 %v690_v59, %v625_v2 }
 0x19a   : > { %v716_v62 = vpack.c.bf16 %v712_v61, %v711_v60  ;;  %v707_v18 = vmax.f32 %v691_v9, 0.0 }
 0x19c   : > { %732 = vmatpush.bf16.msrb.mxu2 %v716_v62 }
 0x19f   : > { %v692_v63 = vpop.f32.mrf.mxu1 }
 0x1a0   : > { %v693_v7 = vadd.f32 %v692_v63, %v630_v5 }
 0x1a2   : > { %v708_v14 = vmax.f32 %v693_v7, 0.0 }
 0x1a4   : > { %v714_v20 = vpack.c.bf16 %v708_v14, %v707_v18 }
 0x1a7   : > { %v695_v1 = vpop.f32.mrf.mxu1 }
 0x1a8   : > { %v696_v4 = vadd.f32 %v695_v1, %v635_v0 }
 0x1aa   : > { %v709_v10 = vmax.f32 %v696_v4, 0.0 }
 0x1af   : > { %v697_v6 = vpop.f32.mrf.mxu1 }
 0x1b0   : > { %v698_v8 = vadd.f32 %v697_v6, %v640_v3 }
 0x1b2   : > { %v710_v11 = vmax.f32 %v698_v8, 0.0 }
 0x1b4   : > { %v715_v15 = vpack.c.bf16 %v710_v11, %v709_v10 }
 0x1b6   : > { %733 = vmatpush.bf16.msrb.mxu2 %v715_v15 }
 0x1ba   : > { %734 = vmatpush.bf16.msrb.mxu2 %v714_v20 }
 0x1be   : > { %735 = vmatpush.bf16.msrb.mxu2 %v713_v22 }
 0x1c1   : > { %897 = vmatmul.msk.bf16.vlgmr.msrb.gmra.mxu2 %vm724_vm1, %v717_v23 }
 0x244   : > { %v737_v25 = vpop.f32.mrf.mxu2 }
 0x245   : > { %v738_v26 = vadd.f32 %v737_v25, %v722_v24 }
 0x247   : > { %741 = vst [vmem:[%s341_s10] sm:$0xf] %v738_v26 }
 0x24c   : > { %v739_v27 = vpop.f32.mrf.mxu2 }
 0x24d PF: > { %s17_s30 = sadd.s32 1, %s1035_s30   ;;  %s1305_s24 = smov %s1015_s25 }
 0x24e   : > { %p14_p12 = scmp.ge.s32.totalorder %s17_s30, 6   ;;  %s1306_s25 = smov %s1129_s14 }
 0x24f   : > { %s1307_s26 = smov %s1027_s28  ;;  %s1308_s27 = smov %s1031_s29 }
 0x250   : > { %s1309_s28 = smov %s1312_s8  ;;  %s1310_s29 = smov %s1316_s9 }
 0x251   :  { %16 = sbr.rel (!%p14_p12) target bundleno = 4 (0x4), region = 121 }

</bundles_post_ra>
